<compile_context>
chip_gen: v6e
topology: v6e:2x2x1
jax: 0.10.0
libtpu: 0.0.40
codegen_flags: <defaults>
</compile_context>

<pallas_src>
import functools

import jax
import jax.numpy as jnp
from jax.experimental import pallas as pl
from jax.experimental.pallas import tpu as pltpu


def _round_up(x, m):
    return (x + m - 1) // m * m


def _glu_kernel(x_ref, w_ref, b_ref, o_ref, *, tp):
    # Single fused projection: (tm, Tp) @ (Tp, 2*Tp) -> (tm, 2*Tp), f32 accum.
    p = jnp.dot(x_ref[...], w_ref[...], preferred_element_type=jnp.float32)
    p = p + b_ref[...]
    p1 = p[:, :tp]            # X @ W1^T + b1
    p2 = p[:, tp:]            # X @ W2^T + b2
    # sigmoid(p2) = 1 / (1 + exp(-p2)): exp + approx reciprocal -> EUP slot.
    gate = pl.reciprocal(1.0 + jnp.exp(-p2), approx=True)
    o_ref[...] = (p1 * gate).astype(o_ref.dtype)


def glu_forward(x, w1, b1, w2, b2, *, tm=None):
    """GLU forward. x: (B, F, T); w1/w2: torch-style (T, T); b1/b2: (T,)."""
    B, F, T = x.shape
    M = B * F

    xbytes = jnp.dtype(x.dtype).itemsize
    sublane = 16 if xbytes < 4 else 8          # bf16 needs 16-row sublane tiles

    # Lane-dense feature dim: pad T up to a multiple of 128.
    Tp = _round_up(T, 128)

    # Large row tiles (bounded so grid stays >= 2 on big problems / megacore).
    if tm is None:
        tm = min(512, _round_up(M, sublane))
    tm = _round_up(tm, sublane)
    Mp = _round_up(M, tm)
    grid_m = Mp // tm

    # Flatten + zero-pad the activation.
    x2d = jnp.pad(x.reshape(M, T), ((0, Mp - M), (0, Tp - T)))

    # Fused, padded weight (Tp, 2*Tp) = [W1^T | W2^T]; matmul dtype follows x.
    w1p = jnp.pad(w1.T, ((0, Tp - T), (0, Tp - T)))
    w2p = jnp.pad(w2.T, ((0, Tp - T), (0, Tp - T)))
    w_cat = jnp.concatenate([w1p, w2p], axis=1).astype(x.dtype)
    # Bias stays f32 (added to the f32 accumulator).
    b_cat = jnp.concatenate(
        [jnp.pad(b1, (0, Tp - T)), jnp.pad(b2, (0, Tp - T))]
    ).astype(jnp.float32).reshape(1, 2 * Tp)

    wbytes = jnp.dtype(w_cat.dtype).itemsize

    # VMEM budget: resident weights/bias (x2 pipeline buffers) + double-
    # buffered x/out row tiles + f32 intermediates, with 2x headroom,
    # clamped to 64 MiB so the same config is valid on v7x.
    needed = (
        2 * (Tp * 2 * Tp + 2 * Tp) * wbytes
        + 2 * tm * Tp * xbytes * 2
        + 3 * tm * 2 * Tp * 4
    )
    vmem_limit = int(min(64 * 2**20, max(2 * needed, 16 * 2**20)))

    cost = pl.CostEstimate(
        flops=4 * Mp * Tp * Tp,                      # (Mp,Tp) @ (Tp,2Tp)
        transcendentals=Mp * Tp,                     # one exp per output elem
        bytes_accessed=2 * Mp * Tp * xbytes + 2 * Tp * Tp * wbytes,
    )

    out2d = pl.pallas_call(
        functools.partial(_glu_kernel, tp=Tp),
        out_shape=jax.ShapeDtypeStruct((Mp, Tp), x.dtype),
        grid_spec=pltpu.PrefetchScalarGridSpec(
            num_scalar_prefetch=0,
            grid=(grid_m,),
            in_specs=[
                pl.BlockSpec((tm, Tp), lambda i: (i, 0)),       # X row tile
                pl.BlockSpec((Tp, 2 * Tp), lambda i: (0, 0)),   # [W1^T|W2^T] resident
                pl.BlockSpec((1, 2 * Tp), lambda i: (0, 0)),    # [b1|b2]
            ],
            out_specs=pl.BlockSpec((tm, Tp), lambda i: (i, 0)),
        ),
        compiler_params=pltpu.CompilerParams(
            dimension_semantics=("parallel",),
            vmem_limit_bytes=vmem_limit,
        ),
        cost_estimate=cost,
    )(x2d, w_cat, b_cat)

    return out2d[:M, :T].reshape(B, F, T)


def glu_reference(x, w1, b1, w2, b2):
    p1 = jnp.einsum("bft,ot->bfo", x, w1) + b1
    p2 = jnp.einsum("bft,ot->bfo", x, w2) + b2
    return p1 * jax.nn.sigmoid(p2)


def _check(out, ref, name):
    assert out.shape == ref.shape, (name, out.shape, ref.shape)
    err = float(jnp.max(jnp.abs(out - ref)))
    assert jnp.allclose(out, ref, atol=2e-3, rtol=2e-3), (name, err)


if __name__ == "__main__":
    key = jax.random.PRNGKey(0)

    # Shapes implied by the module: X is (batch, frames, time=in_size).
    batch, frames, in_size = 2, 8, 32
    k_x, k_w1, k_b1, k_w2, k_b2, k_x2 = jax.random.split(key, 6)

    x = jax.random.normal(k_x, (batch, frames, in_size), dtype=jnp.float32)

    # nn.Linear default init: U(-1/sqrt(in), 1/sqrt(in)).
    bound = 1.0 / (in_size ** 0.5)
    w1 = jax.random.uniform(k_w1, (in_size, in_size), minval=-bound, maxval=bound)
    b1 = jax.random.uniform(k_b1, (in_size,), minval=-bound, maxval=bound)
    w2 = jax.random.uniform(k_w2, (in_size, in_size), minval=-bound, maxval=bound)
    b2 = jax.random.uniform(k_b2, (in_size,), minval=-bound, maxval=bound)

    out = jax.block_until_ready(glu_forward(x, w1, b1, w2, b2))
    _check(out, glu_reference(x, w1, b1, w2, b2), "small")

    # Second shape exercising row padding and a multi-step grid.
    x_big = jax.random.normal(k_x2, (3, 50, in_size), dtype=jnp.float32)
    out_big = jax.block_until_ready(glu_forward(x_big, w1, b1, w2, b2, tm=64))
    _check(out_big, glu_reference(x_big, w1, b1, w2, b2), "padded")

    print("KERNEL_OK")
</pallas_src>

<mosaic_0001>
module attributes {stable_mosaic.version = 11 : i64} {
  func.func @_glu_kernel(%arg0: i32, %arg1: memref<16x128xf32, #tpu.memory_space<vmem>>, %arg2: memref<128x256xf32, #tpu.memory_space<vmem>>, %arg3: memref<1x256xf32, #tpu.memory_space<vmem>>, %arg4: memref<16x128xf32, #tpu.memory_space<vmem>>) attributes {dimension_semantics = [#tpu.dimension_semantics<parallel>], iteration_bounds = array<i64: 1>, scalar_prefetch = 0 : i64, scratch_operands = 0 : i64, tpu.core_type = #tpu.core_type<tc>, window_params = [{transform_indices = @transform_0, window_bounds = array<i64: 16, 128>}, {pipeline_mode = #tpu.pipeline_mode<synchronous>, transform_indices = @transform_1, window_bounds = array<i64: 128, 256>}, {pipeline_mode = #tpu.pipeline_mode<synchronous>, transform_indices = @transform_2, window_bounds = array<i64: 1, 256>}, {transform_indices = @transform_3, window_bounds = array<i64: 16, 128>}]} {
    %c0 = arith.constant 0 : index
    %c0_0 = arith.constant 0 : index
    %0 = vector.load %arg1[%c0, %c0_0] : memref<16x128xf32, #tpu.memory_space<vmem>>, vector<16x128xf32>
    %c0_1 = arith.constant 0 : index
    %c0_2 = arith.constant 0 : index
    %1 = vector.load %arg2[%c0_1, %c0_2] : memref<128x256xf32, #tpu.memory_space<vmem>>, vector<128x256xf32>
    %cst = arith.constant dense<0.000000e+00> : vector<16x256xf32>
    %2 = tpu.matmul %0, %1, %cst {dimension_numbers = #tpu.dot_dimension_numbers<[1], [0], [0], [1], [0, 0, 1, 1], [], []>} : vector<16x128xf32>, vector<128x256xf32>, vector<16x256xf32> -> vector<16x256xf32>
    %c0_3 = arith.constant 0 : index
    %c0_4 = arith.constant 0 : index
    %3 = vector.load %arg3[%c0_3, %c0_4] : memref<1x256xf32, #tpu.memory_space<vmem>>, vector<1x256xf32>
    %4 = vector.broadcast %3 : vector<1x256xf32> to vector<16x256xf32>
    %5 = arith.addf %2, %4 : vector<16x256xf32>
    %6 = vector.extract_strided_slice %5 {offsets = [0, 0], sizes = [16, 128], strides = [1, 1]} : vector<16x256xf32> to vector<16x128xf32>
    %7 = vector.extract_strided_slice %5 {offsets = [0, 128], sizes = [16, 128], strides = [1, 1]} : vector<16x256xf32> to vector<16x128xf32>
    %cst_5 = arith.constant 0.000000e+00 : f32
    %8 = vector.broadcast %cst_5 : f32 to vector<16x128xf32>
    %9 = arith.subf %8, %7 : vector<16x128xf32>
    %10 = math.exp %9 : vector<16x128xf32>
    %cst_6 = arith.constant 1.000000e+00 : f32
    %11 = vector.broadcast %cst_6 : f32 to vector<16x128xf32>
    %12 = arith.addf %11, %10 : vector<16x128xf32>
    %13 = tpu.reciprocal %12 {approx = true} : vector<16x128xf32> -> vector<16x128xf32>
    %14 = arith.mulf %6, %13 : vector<16x128xf32>
    %c0_7 = arith.constant 0 : index
    %c0_8 = arith.constant 0 : index
    %15 = vector.load %arg4[%c0_7, %c0_8] : memref<16x128xf32, #tpu.memory_space<vmem>>, vector<16x128xf32>
    tpu.vector_store %arg4[%c0_7, %c0_8], %14 {strides = array<i32>} : memref<16x128xf32, #tpu.memory_space<vmem>>, vector<16x128xf32>,
    return
  }
  func.func @transform_0(%arg0: i32) -> (i32, i32) {
    %c0_i32 = arith.constant 0 : i32
    %c0_i32_0 = arith.constant 0 : i32
    return %arg0, %c0_i32 : i32, i32
  }
  func.func @transform_1(%arg0: i32) -> (i32, i32) {
    %c0_i32 = arith.constant 0 : i32
    %c0_i32_0 = arith.constant 0 : i32
    %c0_i32_1 = arith.constant 0 : i32
    return %c0_i32, %c0_i32_0 : i32, i32
  }
  func.func @transform_2(%arg0: i32) -> (i32, i32) {
    %c0_i32 = arith.constant 0 : i32
    %c0_i32_0 = arith.constant 0 : i32
    %c0_i32_1 = arith.constant 0 : i32
    return %c0_i32, %c0_i32_0 : i32, i32
  }
  func.func @transform_3(%arg0: i32) -> (i32, i32) {
    %c0_i32 = arith.constant 0 : i32
    %c0_i32_0 = arith.constant 0 : i32
    return %arg0, %c0_i32 : i32, i32
  }
}

</mosaic_0001>

<bundles_post_ra>
// kernel: tpu_custom_call.1
= control target key start
LH: loop header
LB: loop body
LE: loop exit
PB: predicated region body
PF: predicated region fallthrough
CT: control target
= control target key end

     0   :  { %8 = vsyncpa [#allocation3], 0  ;;  %s358_s0 = inlined_call_operand.hbm [shape: f32[16,128], index: 0, kind: input, shape index: {}]   ;;  %s359_s1 = inlined_call_operand.hbm [shape: f32[128,256], index: 1, kind: input, shape index: {}]   ;;  %s360_s2 = inlined_call_operand.vmem [shape: f32[1,256], index: 2, kind: input, shape index: {}]   ;;  %s361_s3 = inlined_call_operand.hbm [shape: f32[16,128], index: 3, kind: output, shape index: {}]  }
   0x1   :  { %9 = vsyncpa [#allocation6], 0 }
   0x2   :  { %10 = vsyncpa [#allocation4], 0  ;;  %s312_s12 = smov [#allocation2]  }
   0x3   :  { %s16_s13 = sshll.u32 %s312_s12, 4  ;;  %s17_s13 = int_to_ptr.vmem [resolvable:$true] %s16_s13 }
   0x4   :  { %s254_s14 = scalar_lea.vmem %s17_s13, 256  ;;  %p259_p1 = scmp.lt.s32.totalorder %s17_s13, %s17_s13 }
   0x5   :  { %p255_p0 = scmp.ne.s32.totalorder %s17_s13, %s254_s14  ;;  %p260_p2 = scmp.lt.s32.totalorder %s254_s14, %s254_s14 }
   0x7   :  { %p261_p3 = por %p260_p2, %p259_p1 }
   0x9   :  { %p262_p4 = pnand %p261_p3, %p255_p0 }
   0xb   :  { %265 = shalt.err (!%p262_p4)
}
   0xc   :  { %s313_s15 = smov 128   ;;  %s314_s16 = smov 8  }
   0xd   :  { %22 = dma.hbm_to_vmem [thread:$0]  %s358_s0, 256, %s17_s13, [#allocation3], %s313_s15, %s313_s15, %s314_s16  }
   0xe   :  { %s315_s19 = smov [#allocation5]  }
   0xf   :  { %s28_s20 = sshll.u32 %s315_s19, 4  ;;  %s29_s20 = int_to_ptr.vmem [resolvable:$true] %s28_s20 }
  0x10   :  { %s274_s21 = scalar_lea.vmem %s29_s20, 4096  ;;  %p279_p6 = scmp.lt.s32.totalorder %s29_s20, %s29_s20 }
  0x11   :  { %p275_p5 = scmp.ne.s32.totalorder %s29_s20, %s274_s21  ;;  %p280_p7 = scmp.lt.s32.totalorder %s274_s21, %s274_s21 }
  0x13   :  { %p281_p8 = por %p280_p7, %p279_p6 }
  0x15   :  { %p282_p9 = pnand %p281_p8, %p275_p5 }
  0x17   :  { %285 = shalt.err (!%p282_p9)
}
  0x18   :  { %s316_s22 = smov 256   ;;  %s317_s23 = smov 16  }
  0x19   :  { %34 = dma.hbm_to_vmem [thread:$0]  %s359_s1, 4096, %s29_s20, [#allocation6], %s316_s22, %s316_s22, %s317_s23  }
  0x1a   :  { %306 = dma.done.wait [#allocation3], 256  }
  0x1b   :  { %307 = vsyncadd [#allocation3], 4294967040 }
  0x1c   :  { %308 = dma.done.wait [#allocation6], 4096  }
  0x1d   :  { %309 = vsyncadd [#allocation6], 4294963200  ;;  %v318_v0 = vmov 0.0   ;;  %v76_v1 = vld [vmem:[#allocation5 + $0xf8] sm:$0xff]  ;;  %v75_v2 = vld [vmem:[#allocation5 + $0xf0] sm:$0xff]  ;;  %v79_v35 = vlaneseq }
  0x1e   :  { %153 = vmatprep.mubr.f32.mxu0 %v318_v0  ;;  %159 = vmatprep.mubr.f32.mxu1 %v318_v0  ;;  %v74_v3 = vld [vmem:[#allocation5 + $0xe8] sm:$0xff]  ;;  %v73_v4 = vld [vmem:[#allocation5 + $0xe0] sm:$0xff]  ;;  %v72_v5 = vld [vmem:[#allocation5 + $0xd8] sm:$0xff] }
  0x1f   :  { %89 = vmatprep.subr.mxu0 %v76_v1  ;;  %198 = vmatprep.subr.mxu1 %v76_v1  ;;  %v71_v6 = vld [vmem:[#allocation5 + $0xd0] sm:$0xff]  ;;  %v70_v7 = vld [vmem:[#allocation5 + $0xc8] sm:$0xff]  ;;  %v69_v8 = vld [vmem:[#allocation5 + $0xc0] sm:$0xff]  ;;  %v80_v36 = vshrl.u32 %v79_v35, 7 }
  0x20   :  { %90 = vmatpush1.msra.mxu0 %v75_v2  ;;  %214 = vmatpush1.msra.mxu1 %v75_v2  ;;  %v68_v9 = vld [vmem:[#allocation5 + $0xb8] sm:$0xff]  ;;  %v67_v10 = vld [vmem:[#allocation5 + $0xb0] sm:$0xff]  ;;  %v66_v11 = vld [vmem:[#allocation5 + $0xa8] sm:$0xff] }
  0x21   :  { %91 = vmatprep.subr.mxu0 %v74_v3  ;;  %199 = vmatprep.subr.mxu1 %v74_v3  ;;  %v65_v12 = vld [vmem:[#allocation5 + $0xa0] sm:$0xff]  ;;  %v64_v13 = vld [vmem:[#allocation5 + $0x98] sm:$0xff]  ;;  %v63_v14 = vld [vmem:[#allocation5 + $0x90] sm:$0xff]  ;;  %v85_v37 = vsub.s32 1, %v80_v36  ;;  %v81_v54 = vsub.s32 0, %v80_v36 }
  0x22   :  { %92 = vmatpush1.msra.mxu0 %v73_v4  ;;  %215 = vmatpush1.msra.mxu1 %v73_v4  ;;  %v62_v15 = vld [vmem:[#allocation5 + $0x88] sm:$0xff]  ;;  %v61_v16 = vld [vmem:[#allocation5 + $0x80] sm:$0xff]  ;;  %v60_v17 = vld [vmem:[#allocation5 + $0x78] sm:$0xff] }
  0x23   :  { %93 = vmatprep.subr.mxu0 %v72_v5  ;;  %200 = vmatprep.subr.mxu1 %v72_v5  ;;  %v59_v18 = vld [vmem:[#allocation5 + $0x70] sm:$0xff]  ;;  %v58_v19 = vld [vmem:[#allocation5 + $0x68] sm:$0xff]  ;;  %v57_v20 = vld [vmem:[#allocation5 + $0x60] sm:$0xff] }
  0x24   :  { %94 = vmatpush1.msra.mxu0 %v71_v6  ;;  %216 = vmatpush1.msra.mxu1 %v71_v6  ;;  %v56_v21 = vld [vmem:[#allocation5 + $0x58] sm:$0xff]  ;;  %v55_v22 = vld [vmem:[#allocation5 + $0x50] sm:$0xff]  ;;  %v54_v23 = vld [vmem:[#allocation5 + $0x48] sm:$0xff] }
  0x25   :  { %95 = vmatprep.subr.mxu0 %v70_v7  ;;  %201 = vmatprep.subr.mxu1 %v70_v7  ;;  %v53_v24 = vld [vmem:[#allocation5 + $0x40] sm:$0xff]  ;;  %v52_v25 = vld [vmem:[#allocation5 + $0x38] sm:$0xff]  ;;  %v51_v26 = vld [vmem:[#allocation5 + $0x30] sm:$0xff] }
  0x26   :  { %96 = vmatpush1.msra.mxu0 %v69_v8  ;;  %217 = vmatpush1.msra.mxu1 %v69_v8  ;;  %v50_v27 = vld [vmem:[#allocation5 + $0x28] sm:$0xff]  ;;  %v49_v28 = vld [vmem:[#allocation5 + $0x20] sm:$0xff]  ;;  %v48_v29 = vld [vmem:[#allocation5 + $0x18] sm:$0xff] }
  0x27   :  { %97 = vmatprep.subr.mxu0 %v68_v9  ;;  %202 = vmatprep.subr.mxu1 %v68_v9  ;;  %v47_v30 = vld [vmem:[#allocation5 + $0x10] sm:$0xff]  ;;  %v46_v31 = vld [vmem:[#allocation5 + $0x8] sm:$0xff]  ;;  %v45_v32 = vld [vmem:[#allocation5] sm:$0xff] }
  0x28   :  { %98 = vmatpush1.msra.mxu0 %v67_v10  ;;  %218 = vmatpush1.msra.mxu1 %v67_v10  ;;  %v43_v33 = vld [vmem:[#allocation2] sm:$0xff]  ;;  %v44_v34 = vld [vmem:[#allocation2 + $0x8] sm:$0xff] }
  0x29   :  { %99 = vmatprep.subr.mxu0 %v66_v11  ;;  %203 = vmatprep.subr.mxu1 %v66_v11  ;;  %v77_v38 = vld [vmem:[%s360_s2] sm:$0x3]  ;;  %s319_s2 = smov [#allocation7]  }
  0x2a   :  { %100 = vmatpush1.msra.mxu0 %v65_v12  ;;  %219 = vmatpush1.msra.mxu1 %v65_v12  ;;  %v86_v39 = vrot.slane %v77_v38, %v85_v37  ;;  %v82_v55 = vrot.slane %v77_v38, %v81_v54  ;;  %s185_s26 = sshll.u32 %s319_s2, 4  ;;  %s186_s26 = int_to_ptr.vmem [resolvable:$true] %s185_s26 }
  0x2b   :  { %101 = vmatprep.subr.mxu0 %v64_v13  ;;  %204 = vmatprep.subr.mxu1 %v64_v13  ;;  %s286_s27 = scalar_lea.vmem %s186_s26, 256  ;;  %p291_p11 = scmp.lt.s32.totalorder %s186_s26, %s186_s26 }
  0x2c   :  { %102 = vmatpush1.msra.mxu0 %v63_v14  ;;  %220 = vmatpush1.msra.mxu1 %v63_v14  ;;  %p287_p10 = scmp.ne.s32.totalorder %s186_s26, %s286_s27  ;;  %p292_p12 = scmp.lt.s32.totalorder %s286_s27, %s286_s27 }
  0x2d   :  { %103 = vmatprep.subr.mxu0 %v62_v15  ;;  %205 = vmatprep.subr.mxu1 %v62_v15 }
  0x2e   :  { %104 = vmatpush1.msra.mxu0 %v61_v16  ;;  %221 = vmatpush1.msra.mxu1 %v61_v16  ;;  %p293_p13 = por %p292_p12, %p291_p11 }
  0x2f   :  { %105 = vmatprep.subr.mxu0 %v60_v17  ;;  %206 = vmatprep.subr.mxu1 %v60_v17 }
  0x30   :  { %106 = vmatpush1.msra.mxu0 %v59_v18  ;;  %222 = vmatpush1.msra.mxu1 %v59_v18  ;;  %p294_p0 = pnand %p293_p13, %p287_p10 }
  0x31   :  { %107 = vmatprep.subr.mxu0 %v58_v19  ;;  %207 = vmatprep.subr.mxu1 %v58_v19 }
  0x32   :  { %108 = vmatpush1.msra.mxu0 %v57_v20  ;;  %223 = vmatpush1.msra.mxu1 %v57_v20 }
  0x33   :  { %109 = vmatprep.subr.mxu0 %v56_v21  ;;  %208 = vmatprep.subr.mxu1 %v56_v21 }
  0x34   :  { %110 = vmatpush1.msra.mxu0 %v55_v22  ;;  %224 = vmatpush1.msra.mxu1 %v55_v22 }
  0x35   :  { %111 = vmatprep.subr.mxu0 %v54_v23  ;;  %209 = vmatprep.subr.mxu1 %v54_v23 }
  0x36   :  { %112 = vmatpush1.msra.mxu0 %v53_v24  ;;  %225 = vmatpush1.msra.mxu1 %v53_v24 }
  0x37   :  { %113 = vmatprep.subr.mxu0 %v52_v25  ;;  %210 = vmatprep.subr.mxu1 %v52_v25 }
  0x38   :  { %114 = vmatpush1.msra.mxu0 %v51_v26  ;;  %226 = vmatpush1.msra.mxu1 %v51_v26 }
  0x39   :  { %115 = vmatprep.subr.mxu0 %v50_v27  ;;  %211 = vmatprep.subr.mxu1 %v50_v27 }
  0x3a   :  { %116 = vmatpush1.msra.mxu0 %v49_v28  ;;  %227 = vmatpush1.msra.mxu1 %v49_v28 }
  0x3b   :  { %117 = vmatprep.subr.mxu0 %v48_v29  ;;  %212 = vmatprep.subr.mxu1 %v48_v29 }
  0x3c   :  { %118 = vmatpush1.msra.mxu0 %v47_v30  ;;  %228 = vmatpush1.msra.mxu1 %v47_v30 }
  0x3d   :  { %119 = vmatprep.subr.mxu0 %v46_v31  ;;  %213 = vmatprep.subr.mxu1 %v46_v31 }
  0x3e   :  { %120 = vmatpush1.msra.mxu0 %v45_v32  ;;  %229 = vmatpush1.msra.mxu1 %v45_v32 }
  0x3f   :  { %154 = vmatmul.mubr.f32.vlgmr.msra.gmra.mxu0 %v43_v33  ;;  %160 = vmatmul.mubr.f32.vlgmr.msra.gmra.mxu1 %v44_v34 }
  0xff   :  { %v155_v40 = vpop.f32.mrf.mxu0  ;;  %v161_v41 = vpop.f32.mrf.mxu1 }
 0x100   :  { %v156_v56 = vadd.f32 %v155_v40, %v82_v55  ;;  %v162_v58 = vadd.f32 %v161_v41, %v82_v55 }
 0x101   :  { %v157_v42 = vpop.f32.mrf.mxu0  ;;  %v163_v43 = vpop.f32.mrf.mxu1 }
 0x102   :  { %v158_v44 = vadd.f32 %v157_v42, %v86_v39  ;;  %v164_v45 = vadd.f32 %v163_v43, %v86_v39 }
 0x104   :  { %v166_v46 = vsub.f32 0.0, %v158_v44  ;;  %v167_v47 = vsub.f32 0.0, %v164_v45 }
 0x106   :  { %v168_v48 = vmul.f32 1.442695, %v166_v46  ;;  %v170_v49 = vmul.f32 1.442695, %v167_v47 }
 0x108   :  { %238 = vpow2.f32 %v168_v48 }
 0x109   :  { %240 = vpow2.f32 %v170_v49 }
 0x115   :  { %v239_v50 = vpop.eup %238 }
 0x116   :  { %v241_v51 = vpop.eup %240  ;;  %v172_v52 = vadd.f32 1.0, %v239_v50 }
 0x117   :  { %v173_v53 = vadd.f32 1.0, %v241_v51 }
 0x118   :  { %242 = vrcp.f32 %v172_v52 }
 0x119   :  { %244 = vrcp.f32 %v173_v53 }
 0x125   :  { %v243_v57 = vpop.eup %242 }
 0x126   :  { %v245_v59 = vpop.eup %244  ;;  %v176_v60 = vmul.f32 %v243_v57, %v156_v56 }
 0x127   :  { %v177_v61 = vmul.f32 %v245_v59, %v162_v58 }
 0x128   :  { %178 = vst [vmem:[#allocation7] sm:$0xff] %v176_v60 }
 0x129   :  { %179 = vst [vmem:[#allocation7 + $0x8] sm:$0xff] %v177_v61 }
 0x12a   :  { %297 = shalt.err (!%p294_p0)
}
 0x12b   :  { %191 = dma.vmem_to_hbm [thread:$0]  %s186_s26, 256, %s361_s3, [#allocation4], %s313_s15, %s313_s15, %s314_s16  }
 0x12c   :  { %310 = dma.done.wait [#allocation4], 256  }
 0x12d   :  { %311 = vsyncadd [#allocation4], 4294967040 }
 0x12e   :  { %195 = vsyncpa [#allocation3], 1 }
 0x12f   :  { %196 = vsyncpa [#allocation6], 1 }
 0x130   :  { %197 = vsyncpa [#allocation4], 1 }

</bundles_post_ra>
